<compile_context>
chip_gen: v7x
topology: tpu7x:2x2x1
jax: 0.10.0
libtpu: 0.0.40
codegen_flags: <defaults>
</compile_context>

<pallas_src>
import numpy as np
import jax
import jax.numpy as jnp
from jax.experimental import pallas as pl
from jax.experimental.pallas import tpu as pltpu


def _round_up(x: int, m: int) -> int:
    return ((x + m - 1) // m) * m


def film_kernel(scale_ref, beta_ref, x_ref, o_ref):
    # scale_ref, beta_ref: (TR, 1) f32 per-row FiLM params (scale = 1 + gamma)
    # x_ref, o_ref:        (TR, TL) lane-dense streaming block
    o_ref[...] = (scale_ref[...] * x_ref[...] + beta_ref[...]).astype(o_ref.dtype)


def _tile_config(rows: int, hw: int, itemsize: int):
    """Generation-aware (TR, TL, vmem_limit) selection."""
    kind = ""
    try:
        kind = jax.devices()[0].device_kind.lower()
    except Exception:  # pragma: no cover
        pass
    is_v7 = ("v7" in kind) or ("7x" in kind)
    is_v6 = "v6" in kind

    if is_v7:
        block_budget = 8 << 20           # 8 MiB block; 4x double-buffer = 32 MiB
        vmem_limit = 48 << 20            # raise scoped VMEM explicitly (< 64 MiB phys)
    elif is_v6:
        block_budget = 4 << 20           # 16 MiB footprint fits the 32 MiB default
        vmem_limit = None
    else:                                # v5e / unknown: conservative (16 MiB default)
        block_budget = 2 << 20
        vmem_limit = None

    # dtype-aware sublane packing: 8 (f32) / 16 (bf16) / 32 (int8/fp8)
    packing = 8 * max(1, 4 // itemsize)

    # Prefer full-row lane tiles (single contiguous HBM run per row).
    tl_full = _round_up(hw, 128)
    if tl_full * packing * itemsize <= block_budget:
        tl = tl_full
    else:
        tl = max(128, (block_budget // (packing * itemsize)) // 128 * 128)

    tr = max(packing, (block_budget // (tl * itemsize)) // packing * packing)
    tr = min(tr, _round_up(rows, packing))

    # v7x has 2 TensorCores: make sure both get blocks along a parallel axis.
    if is_v7:
        if pl.cdiv(rows, tr) == 1 and rows > packing:
            tr = _round_up(pl.cdiv(rows, 2), packing)
        elif pl.cdiv(rows, tr) == 1 and pl.cdiv(hw, tl) == 1 and hw > 128:
            tl = max(128, _round_up(pl.cdiv(hw, 2), 128))

    return tr, tl, vmem_limit


def linear_film(x, cond, w, bias, *, min_pallas_bytes=1 << 20):
    """FiLM forward.

    x:    (B, C, H, W)
    cond: (B, cond_dim)
    w:    (2C, cond_dim)   -- nn.Linear weight (out x in)
    bias: (2C,)
    """
    B, C, H, W = x.shape
    rows, hw = B * C, H * W

    # --- conditioning projection, hoisted out of the kernel; "+1" pre-folded ---
    gb = (jnp.dot(cond.astype(jnp.float32), w.T.astype(jnp.float32))
          + bias.astype(jnp.float32))          # (B, 2C)
    scale = 1.0 + gb[:, :C]                    # (B, C)
    beta = gb[:, C:]                           # (B, C)

    itemsize = jnp.dtype(x.dtype).itemsize

    # --- tiny-input fast path: fused XLA elementwise beats a kernel launch ---
    if rows * hw * itemsize < min_pallas_bytes:
        out = scale[:, :, None, None] * x + beta[:, :, None, None]
        return out.astype(x.dtype)

    scale_col = scale.reshape(rows, 1)
    beta_col = beta.reshape(rows, 1)
    x_flat = x.reshape(rows, hw)               # lane-dense (B*C, H*W) view

    TR, TL, vmem_limit = _tile_config(rows, hw, itemsize)
    grid = (pl.cdiv(rows, TR), pl.cdiv(hw, TL))   # ragged edges masked by Pallas

    cost = pl.CostEstimate(
        flops=2 * rows * hw,
        transcendentals=0,
        bytes_accessed=int(2 * rows * hw * itemsize + 2 * rows * 4),
    )

    cp_kwargs = dict(dimension_semantics=("parallel", "parallel"))
    if vmem_limit is not None:
        cp_kwargs["vmem_limit_bytes"] = int(vmem_limit)

    out = pl.pallas_call(
        film_kernel,
        out_shape=jax.ShapeDtypeStruct((rows, hw), x.dtype),
        grid_spec=pltpu.PrefetchScalarGridSpec(
            num_scalar_prefetch=0,
            grid=grid,
            in_specs=[
                pl.BlockSpec((TR, 1), lambda i, j: (i, 0)),    # scale per-row
                pl.BlockSpec((TR, 1), lambda i, j: (i, 0)),    # beta per-row
                pl.BlockSpec((TR, TL), lambda i, j: (i, j)),   # x block
            ],
            out_specs=pl.BlockSpec((TR, TL), lambda i, j: (i, j)),
        ),
        compiler_params=pltpu.CompilerParams(**cp_kwargs),
        cost_estimate=cost,
    )(scale_col, beta_col, x_flat)

    return out.reshape(B, C, H, W)


def _reference(x, cond, w, bias):
    C = x.shape[1]
    gb = cond @ w.T + bias
    gamma, beta = gb[:, :C], gb[:, C:]
    return (1.0 + gamma)[:, :, None, None] * x + beta[:, :, None, None]


if __name__ == "__main__":
    # Small shapes consistent with the module's forward contract.
    B, num_filters, cond_dim, H, W = 2, 4, 8, 16, 16

    key = jax.random.PRNGKey(0)
    kx, kc, kw, kx2, kc2 = jax.random.split(key, 5)

    x = jax.random.normal(kx, (B, num_filters, H, W), dtype=jnp.float32)
    cond = jax.random.normal(kc, (B, cond_dim), dtype=jnp.float32)

    # nn.Linear(cond_dim, 2*num_filters): weight (2C, cond_dim) orthogonal(std=sqrt(2)),
    # bias constant 0 — deterministic synthetic init (no checkpoint load).
    w = jax.nn.initializers.orthogonal(scale=float(np.sqrt(2.0)))(
        kw, (2 * num_filters, cond_dim), jnp.float32)
    bias = jnp.zeros((2 * num_filters,), dtype=jnp.float32)

    # 1) Force the Pallas path at the small test shape.
    out = jax.block_until_ready(linear_film(x, cond, w, bias, min_pallas_bytes=0))
    ref = _reference(x, cond, w, bias)
    assert out.shape == (B, num_filters, H, W)
    assert jnp.allclose(out, ref, atol=1e-5, rtol=1e-5)

    # 2) Ragged shapes (rows/lanes not tile multiples) through the Pallas path:
    #    exercises the masked edge-tile handling that replaced the pad/slice.
    B2, C2, H2, W2 = 3, 5, 17, 33
    x2 = jax.random.normal(kx2, (B2, C2, H2, W2), dtype=jnp.float32)
    cond2 = jax.random.normal(kc2, (B2, cond_dim), dtype=jnp.float32)
    w2 = jax.nn.initializers.orthogonal(scale=float(np.sqrt(2.0)))(
        kw, (2 * C2, cond_dim), jnp.float32)
    bias2 = jnp.zeros((2 * C2,), dtype=jnp.float32)
    out2 = jax.block_until_ready(linear_film(x2, cond2, w2, bias2, min_pallas_bytes=0))
    assert jnp.allclose(out2, _reference(x2, cond2, w2, bias2), atol=1e-5, rtol=1e-5)

    # 3) Default call (tiny input -> fused-XLA fast path) must match too.
    out3 = jax.block_until_ready(linear_film(x, cond, w, bias))
    assert jnp.allclose(out3, ref, atol=1e-5, rtol=1e-5)

    print("KERNEL_OK")
</pallas_src>

<mosaic_0001>
module attributes {stable_mosaic.version = 11 : i64} {
  func.func @film_kernel(%arg0: i32, %arg1: i32, %arg2: memref<8x1xf32, #tpu.memory_space<vmem>>, %arg3: memref<8x1xf32, #tpu.memory_space<vmem>>, %arg4: memref<8x256xf32, #tpu.memory_space<vmem>>, %arg5: memref<8x256xf32, #tpu.memory_space<vmem>>) attributes {dimension_semantics = [#tpu.dimension_semantics<parallel>, #tpu.dimension_semantics<parallel>], iteration_bounds = array<i64: 1, 1>, scalar_prefetch = 0 : i64, scratch_operands = 0 : i64, tpu.core_type = #tpu.core_type<tc>, window_params = [{transform_indices = @transform_0, window_bounds = array<i64: 8, 1>}, {transform_indices = @transform_1, window_bounds = array<i64: 8, 1>}, {transform_indices = @transform_2, window_bounds = array<i64: 8, 256>}, {transform_indices = @transform_3, window_bounds = array<i64: 8, 256>}]} {
    %c0 = arith.constant 0 : index
    %c0_0 = arith.constant 0 : index
    %0 = vector.load %arg2[%c0, %c0_0] : memref<8x1xf32, #tpu.memory_space<vmem>>, vector<8x1xf32>
    %c0_1 = arith.constant 0 : index
    %c0_2 = arith.constant 0 : index
    %1 = vector.load %arg4[%c0_1, %c0_2] : memref<8x256xf32, #tpu.memory_space<vmem>>, vector<8x256xf32>
    %2 = vector.broadcast %0 : vector<8x1xf32> to vector<8x256xf32>
    %3 = arith.mulf %2, %1 : vector<8x256xf32>
    %c0_3 = arith.constant 0 : index
    %c0_4 = arith.constant 0 : index
    %4 = vector.load %arg3[%c0_3, %c0_4] : memref<8x1xf32, #tpu.memory_space<vmem>>, vector<8x1xf32>
    %5 = vector.broadcast %4 : vector<8x1xf32> to vector<8x256xf32>
    %6 = arith.addf %3, %5 : vector<8x256xf32>
    %c0_5 = arith.constant 0 : index
    %c0_6 = arith.constant 0 : index
    %7 = vector.load %arg5[%c0_5, %c0_6] : memref<8x256xf32, #tpu.memory_space<vmem>>, vector<8x256xf32>
    tpu.vector_store %arg5[%c0_5, %c0_6], %6 {strides = array<i32>} : memref<8x256xf32, #tpu.memory_space<vmem>>, vector<8x256xf32>,
    return
  }
  func.func @transform_0(%arg0: i32, %arg1: i32) -> (i32, i32) {
    %c0_i32 = arith.constant 0 : i32
    %c0_i32_0 = arith.constant 0 : i32
    return %arg0, %c0_i32 : i32, i32
  }
  func.func @transform_1(%arg0: i32, %arg1: i32) -> (i32, i32) {
    %c0_i32 = arith.constant 0 : i32
    %c0_i32_0 = arith.constant 0 : i32
    return %arg0, %c0_i32 : i32, i32
  }
  func.func @transform_2(%arg0: i32, %arg1: i32) -> (i32, i32) {
    %c0_i32 = arith.constant 0 : i32
    return %arg0, %arg1 : i32, i32
  }
  func.func @transform_3(%arg0: i32, %arg1: i32) -> (i32, i32) {
    %c0_i32 = arith.constant 0 : i32
    return %arg0, %arg1 : i32, i32
  }
}

</mosaic_0001>

<bundles_post_ra>
// kernel: tpu_custom_call.1
= control target key start
LH: loop header
LB: loop body
LE: loop exit
PB: predicated region body
PF: predicated region fallthrough
CT: control target
= control target key end

     0   :  { %v76_v1 = vmov 0   ;;  %s122_s0 = inlined_call_operand.vmem [shape: f32[8,1], index: 0, kind: input, shape index: {}]   ;;  %s123_s1 = inlined_call_operand.vmem [shape: f32[8,1], index: 1, kind: input, shape index: {}]   ;;  %s124_s2 = inlined_call_operand.vmem [shape: f32[8,256], index: 2, kind: input, shape index: {}]   ;;  %s125_s3 = inlined_call_operand.hbm [shape: f32[8,256], index: 3, kind: output, shape index: {}]  }
   0x1   :  { %v15_v0 = vld [vmem:[%s122_s0] sm:$0xff]  ;;  %51 = vset.pattern.permute.xlu0 %v76_v1 }
   0x2   :  { %8 = vsyncpa [#allocation3], 0  ;;  %20 = vperm.xlu0 %51, %v15_v0   ;;  %v25_v2 = vld [vmem:[%s123_s1] sm:$0xff]  ;;  %v17_v4 = vld [vmem:[%s124_s2 + $0x8] sm:$0xff]  ;;  %s77_s20 = smov [#allocation2]  }
   0x3   :  { %v16_v3 = vld [vmem:[%s124_s2] sm:$0xff]  ;;  %s41_s0 = sshll.u32 %s77_s20, 4  ;;  %s42_s0 = int_to_ptr.vmem [resolvable:$true] %s41_s0 }
   0x4   :  { %s52_s1 = scalar_lea.vmem %s42_s0, 256  ;;  %p57_p1 = scmp.lt.s32.totalorder %s42_s0, %s42_s0 }
   0x5   :  { %p53_p0 = scmp.ne.s32.totalorder %s42_s0, %s52_s1  ;;  %p58_p2 = scmp.lt.s32.totalorder %s52_s1, %s52_s1 }
   0x6   :  { %28 = vperm.xlu0 %51, %v25_v2  }
   0x7   :  { %p59_p3 = por %p58_p2, %p57_p1 }
   0x9   :  { %p60_p4 = pnand %p59_p3, %p53_p0 }
  0x81   :  { %v21_v5 = vpop.permute.xlu0 %20 }
  0x82   :  { %v23_v6 = vmul.f32 %v21_v5, %v16_v3  ;;  %v24_v7 = vmul.f32 %v21_v5, %v17_v4 }
  0x85   :  { %v29_v8 = vpop.permute.xlu0 %28 }
  0x86   :  { %v31_v9 = vadd.f32 %v29_v8, %v23_v6  ;;  %v32_v10 = vadd.f32 %v29_v8, %v24_v7 }
  0x88   :  { %33 = vst [vmem:[#allocation2] sm:$0xff] %v31_v9  ;;  %34 = vst [vmem:[#allocation2 + $0x8] sm:$0xff] %v32_v10 }
  0x89   :  { %63 = shalt.err (!%p60_p4)
}
  0x8a   :  { %s64_s22 = scalar_lea.hbm %s125_s3, 256 }
  0x8b   :  { %p65_p5 = scmp.ne.s32.totalorder %s125_s3, %s64_s22  ;;  %p68_p6 = scmp.lt.u32.totalorder %s64_s22, %s125_s3 }
  0x8d   :  { %p70_p7 = pnand %p68_p6, %p65_p5 }
  0x8f   :  { %73 = shalt.err (!%p70_p7)
}
  0x90   :  { %44 = dma.vmem_to_hbm [thread:$0]  %s42_s0, 256, %s125_s3, [#allocation3]  }
  0x91   :  { %74 = dma.done.wait [#allocation3], 256  }
  0x92   :  { %75 = vsyncadd [#allocation3], 4294967040 }
  0x93   :  { %48 = vsyncpa [#allocation3], 1 }

</bundles_post_ra>
